<compile_context>
chip_gen: v6e
topology: v6e:2x2x1
jax: 0.10.0
libtpu: 0.0.40
codegen_flags: <defaults>
</compile_context>

<pallas_src>
import functools

import jax
import jax.numpy as jnp
from jax.experimental import pallas as pl
from jax.experimental.pallas import tpu as pltpu

# 2048 rows x 128 lanes x 4 B = 1 MiB per tile per streamed input. With
# double-buffering of the three streamed inputs that is ~6 MiB of VMEM:
# safe on v5e (16 MiB scoped default), v6e and v7x (64 MiB physical), while
# amortizing the ~0.35 us per-grid-step overhead.
_TILE_R = 2048


def _custom_loss_kernel(x_ref, y_ref, p_ref, z_ref, out_ref, acc_mse, acc_reg,
                        *, num_xy_tiles, num_p_tiles, n_el):
    i = pl.program_id(0)

    @pl.when(i == 0)
    def _init():
        acc_mse[...] = jnp.zeros_like(acc_mse)
        acc_reg[...] = jnp.zeros_like(acc_reg)

    # Streamed MSE partial: sum of squared diffs, kept vector-shaped (8, 128).
    @pl.when(i < num_xy_tiles)
    def _mse():
        d = x_ref[...] - y_ref[...]
        sq = d * d
        acc_mse[...] += jnp.sum(sq.reshape(-1, 8, 128), axis=0)

    # Streamed L1 partial over the packed parameter slab.
    @pl.when(i < num_p_tiles)
    def _l1():
        a = jnp.abs(p_ref[...])
        acc_reg[...] += jnp.sum(a.reshape(-1, 8, 128), axis=0)

    # Finalize: single cross-lane reduce + small z-variance term, done once.
    @pl.when(i == pl.num_programs(0) - 1)
    def _finalize():
        mse = jnp.sum(acc_mse[...]) * (1.0 / n_el)
        reg = jnp.sum(acc_reg[...])
        z = z_ref[...]
        mu = jnp.mean(z, axis=0, keepdims=True)
        c = z - mu
        var_sum = jnp.sum(jnp.mean(c * c, axis=0))  # biased var per column
        out_ref[0, 0] = mse + 0.1 / var_sum + 1e-7 * reg


def _to_lane_slab(flat, tile_r):
    """Zero-pad a flat f32 vector and reshape to (k * tile_r, 128)."""
    pad = (-flat.size) % (tile_r * 128)
    if pad:
        flat = jnp.pad(flat, (0, pad))
    return flat.reshape(-1, 128)


def custom_loss(x, y, z, params):
    """x, y: (B, C, H, W) f32 ; z: (N, D) f32 ; params: list of f32 arrays."""
    assert x.shape == y.shape
    n_el = x.size

    # Tile row count: full streaming tiles for big inputs, a small multiple of
    # 8 for toy shapes (block last-two dims must respect (8, 128)).
    rows_x = (n_el + 127) // 128
    tile_r = min(_TILE_R, max(8, ((rows_x + 7) // 8) * 8))

    xf = x.reshape(-1).astype(jnp.float32)
    yf = y.reshape(-1).astype(jnp.float32)
    x2 = _to_lane_slab(xf, tile_r)
    y2 = _to_lane_slab(yf, tile_r)
    num_xy_tiles = x2.shape[0] // tile_r

    # Pack params once into a lane-dense slab (zero pad doesn't change sum|.|).
    # In real training, hoist this packing out of the hot path and reuse it.
    p_flat = jnp.concatenate([p.reshape(-1).astype(jnp.float32) for p in params])
    p2 = _to_lane_slab(p_flat, tile_r)
    num_p_tiles = p2.shape[0] // tile_r

    z2 = z.astype(jnp.float32)

    grid_n = max(num_xy_tiles, num_p_tiles)

    kernel = functools.partial(
        _custom_loss_kernel,
        num_xy_tiles=num_xy_tiles,
        num_p_tiles=num_p_tiles,
        n_el=float(n_el),
    )

    # Clamp block indices once their stream is exhausted -> no re-DMA, and the
    # corresponding accumulation is gated off by pl.when inside the kernel.
    xy_map = lambda i: (jnp.minimum(i, num_xy_tiles - 1), 0)
    p_map = lambda i: (jnp.minimum(i, num_p_tiles - 1), 0)

    cost = pl.CostEstimate(
        flops=3 * int(n_el) + 2 * int(p_flat.size) + 4 * int(z.size),
        transcendentals=0,
        bytes_accessed=4 * (int(x.size) + int(y.size) + int(z.size)
                            + int(p_flat.size)) + 4,
    )

    out = pl.pallas_call(
        kernel,
        out_shape=jax.ShapeDtypeStruct((1, 1), jnp.float32),
        grid_spec=pltpu.PrefetchScalarGridSpec(
            num_scalar_prefetch=0,
            grid=(grid_n,),
            in_specs=[
                pl.BlockSpec((tile_r, 128), xy_map),           # x stream
                pl.BlockSpec((tile_r, 128), xy_map),           # y stream
                pl.BlockSpec((tile_r, 128), p_map),            # params stream
                pl.BlockSpec(z2.shape, lambda i: (0, 0)),      # z, fetched once
            ],
            out_specs=pl.BlockSpec(memory_space=pltpu.SMEM),
            scratch_shapes=[
                pltpu.VMEM((8, 128), jnp.float32),  # MSE accumulator
                pltpu.VMEM((8, 128), jnp.float32),  # L1 accumulator
            ],
        ),
        compiler_params=pltpu.CompilerParams(
            dimension_semantics=("arbitrary",),   # reduction axis (accumulators)
            vmem_limit_bytes=32 * 1024 * 1024,
        ),
        cost_estimate=cost,
    )(x2, y2, p2, z2)
    return out[0, 0]


def _reference(x, y, z, params):
    reg = sum(jnp.sum(jnp.abs(p)) for p in params)
    var_sum = jnp.sum(jnp.var(z.T, axis=1, ddof=0))
    return jnp.mean((x - y) ** 2) + 0.1 / var_sum + 1e-7 * reg


if __name__ == "__main__":
    key = jax.random.PRNGKey(0)
    k1, k2, k3, k4, k5, k6, k7 = jax.random.split(key, 7)

    # Small shapes consistent with the forward: image-like x, y; feature matrix z.
    x = jax.random.normal(k1, (2, 4, 16, 16), dtype=jnp.float32)
    y = jax.random.normal(k2, (2, 4, 16, 16), dtype=jnp.float32)
    z = jax.random.normal(k3, (8, 32), dtype=jnp.float32)

    # Deterministic synthetic "model" parameters (shapes of a tiny autoencoder).
    params = [
        jax.random.normal(k4, (4, 4, 3, 3), dtype=jnp.float32),  # conv weight
        jax.random.normal(k5, (4,), dtype=jnp.float32),          # conv bias
        jax.random.normal(k6, (32, 16), dtype=jnp.float32),      # linear weight
        jax.random.normal(k7, (16,), dtype=jnp.float32),         # linear bias
    ]

    loss = custom_loss(x, y, z, params)
    jax.block_until_ready(loss)

    ref = _reference(x, y, z, params)
    assert jnp.allclose(loss, ref, rtol=1e-5, atol=1e-6), (loss, ref)
    print("KERNEL_OK")
</pallas_src>

<mosaic_0001>
module attributes {stable_mosaic.version = 11 : i64} {
  func.func @_custom_loss_kernel(%arg0: i32, %arg1: memref<16x128xf32, #tpu.memory_space<vmem>>, %arg2: memref<16x128xf32, #tpu.memory_space<vmem>>, %arg3: memref<16x128xf32, #tpu.memory_space<vmem>>, %arg4: memref<8x32xf32, #tpu.memory_space<vmem>>, %arg5: memref<1x1xf32, #tpu.memory_space<smem>>, %arg6: memref<8x128xf32, #tpu.memory_space<vmem>>, %arg7: memref<8x128xf32, #tpu.memory_space<vmem>>) attributes {dimension_semantics = [#tpu.dimension_semantics<arbitrary>], iteration_bounds = array<i64: 1>, scalar_prefetch = 0 : i64, scratch_operands = 2 : i64, tpu.core_type = #tpu.core_type<tc>, window_params = [{transform_indices = @transform_0, window_bounds = array<i64: 16, 128>}, {transform_indices = @transform_1, window_bounds = array<i64: 16, 128>}, {transform_indices = @transform_2, window_bounds = array<i64: 16, 128>}, {pipeline_mode = #tpu.pipeline_mode<synchronous>, transform_indices = @transform_3, window_bounds = array<i64: 8, 32>}, {transform_indices = @transform_4, window_bounds = array<i64: 1, 1>}]} {
    %c0_i32 = arith.constant 0 : i32
    %0 = arith.cmpi eq, %arg0, %c0_i32 : i32
    %1 = arith.extui %0 : i1 to i32
    %c0_i32_0 = arith.constant 0 : i32
    %2 = arith.cmpi ne, %1, %c0_i32_0 : i32
    scf.if %2 {
      %cst = arith.constant 0.000000e+00 : f32
      %12 = vector.broadcast %cst : f32 to vector<8x128xf32>
      %c0 = arith.constant 0 : index
      %c0_6 = arith.constant 0 : index
      %13 = vector.load %arg6[%c0, %c0_6] : memref<8x128xf32, #tpu.memory_space<vmem>>, vector<8x128xf32>
      tpu.vector_store %arg6[%c0, %c0_6], %12 {strides = array<i32>} : memref<8x128xf32, #tpu.memory_space<vmem>>, vector<8x128xf32>,
      %cst_7 = arith.constant 0.000000e+00 : f32
      %14 = vector.broadcast %cst_7 : f32 to vector<8x128xf32>
      %c0_8 = arith.constant 0 : index
      %c0_9 = arith.constant 0 : index
      %15 = vector.load %arg7[%c0_8, %c0_9] : memref<8x128xf32, #tpu.memory_space<vmem>>, vector<8x128xf32>
      tpu.vector_store %arg7[%c0_8, %c0_9], %14 {strides = array<i32>} : memref<8x128xf32, #tpu.memory_space<vmem>>, vector<8x128xf32>,
    } else {
    }
    %c1_i32 = arith.constant 1 : i32
    %3 = arith.cmpi slt, %arg0, %c1_i32 : i32
    %4 = arith.extui %3 : i1 to i32
    %c0_i32_1 = arith.constant 0 : i32
    %5 = arith.cmpi ne, %4, %c0_i32_1 : i32
    scf.if %5 {
      %c0 = arith.constant 0 : index
      %c0_6 = arith.constant 0 : index
      %12 = vector.load %arg1[%c0, %c0_6] : memref<16x128xf32, #tpu.memory_space<vmem>>, vector<16x128xf32>
      %c0_7 = arith.constant 0 : index
      %c0_8 = arith.constant 0 : index
      %13 = vector.load %arg2[%c0_7, %c0_8] : memref<16x128xf32, #tpu.memory_space<vmem>>, vector<16x128xf32>
      %14 = arith.subf %12, %13 : vector<16x128xf32>
      %15 = arith.mulf %14, %14 : vector<16x128xf32>
      %c0_9 = arith.constant 0 : index
      %c0_10 = arith.constant 0 : index
      %16 = vector.load %arg6[%c0_9, %c0_10] : memref<8x128xf32, #tpu.memory_space<vmem>>, vector<8x128xf32>
      %17 = vector.shape_cast %15 : vector<16x128xf32> to vector<2x8x128xf32>
      %cst = arith.constant dense<0.000000e+00> : vector<8x128xf32>
      %18 = vector.multi_reduction <add>, %17, %cst [0] : vector<2x8x128xf32> to vector<8x128xf32>
      %19 = arith.addf %16, %18 : vector<8x128xf32>
      %c0_11 = arith.constant 0 : index
      %c0_12 = arith.constant 0 : index
      %20 = vector.load %arg6[%c0_11, %c0_12] : memref<8x128xf32, #tpu.memory_space<vmem>>, vector<8x128xf32>
      tpu.vector_store %arg6[%c0_11, %c0_12], %19 {strides = array<i32>} : memref<8x128xf32, #tpu.memory_space<vmem>>, vector<8x128xf32>,
    } else {
    }
    %c1_i32_2 = arith.constant 1 : i32
    %6 = arith.cmpi slt, %arg0, %c1_i32_2 : i32
    %7 = arith.extui %6 : i1 to i32
    %c0_i32_3 = arith.constant 0 : i32
    %8 = arith.cmpi ne, %7, %c0_i32_3 : i32
    scf.if %8 {
      %c0 = arith.constant 0 : index
      %c0_6 = arith.constant 0 : index
      %12 = vector.load %arg3[%c0, %c0_6] : memref<16x128xf32, #tpu.memory_space<vmem>>, vector<16x128xf32>
      %13 = math.absf %12 : vector<16x128xf32>
      %c0_7 = arith.constant 0 : index
      %c0_8 = arith.constant 0 : index
      %14 = vector.load %arg7[%c0_7, %c0_8] : memref<8x128xf32, #tpu.memory_space<vmem>>, vector<8x128xf32>
      %15 = vector.shape_cast %13 : vector<16x128xf32> to vector<2x8x128xf32>
      %cst = arith.constant dense<0.000000e+00> : vector<8x128xf32>
      %16 = vector.multi_reduction <add>, %15, %cst [0] : vector<2x8x128xf32> to vector<8x128xf32>
      %17 = arith.addf %14, %16 : vector<8x128xf32>
      %c0_9 = arith.constant 0 : index
      %c0_10 = arith.constant 0 : index
      %18 = vector.load %arg7[%c0_9, %c0_10] : memref<8x128xf32, #tpu.memory_space<vmem>>, vector<8x128xf32>
      tpu.vector_store %arg7[%c0_9, %c0_10], %17 {strides = array<i32>} : memref<8x128xf32, #tpu.memory_space<vmem>>, vector<8x128xf32>,
    } else {
    }
    %c0_i32_4 = arith.constant 0 : i32
    %9 = arith.cmpi eq, %arg0, %c0_i32_4 : i32
    %10 = arith.extui %9 : i1 to i32
    %c0_i32_5 = arith.constant 0 : i32
    %11 = arith.cmpi ne, %10, %c0_i32_5 : i32
    scf.if %11 {
      %c0 = arith.constant 0 : index
      %c0_6 = arith.constant 0 : index
      %12 = vector.load %arg6[%c0, %c0_6] : memref<8x128xf32, #tpu.memory_space<vmem>>, vector<8x128xf32>
      %13 = vector.shape_cast %12 : vector<8x128xf32> to vector<1x8x128xf32>
      %cst = arith.constant dense<0.000000e+00> : vector<1xf32>
      %14 = vector.multi_reduction <add>, %13, %cst [1, 2] : vector<1x8x128xf32> to vector<1xf32>
      %15 = vector.shape_cast %14 : vector<1xf32> to vector<1x1x1xf32>
      %16 = vector.extract %15[0, 0, 0] : f32 from vector<1x1x1xf32>
      %cst_7 = arith.constant 4.8828125E-4 : f32
      %17 = arith.mulf %16, %cst_7 : f32
      %c0_8 = arith.constant 0 : index
      %c0_9 = arith.constant 0 : index
      %18 = vector.load %arg7[%c0_8, %c0_9] : memref<8x128xf32, #tpu.memory_space<vmem>>, vector<8x128xf32>
      %19 = vector.shape_cast %18 : vector<8x128xf32> to vector<1x8x128xf32>
      %cst_10 = arith.constant dense<0.000000e+00> : vector<1xf32>
      %20 = vector.multi_reduction <add>, %19, %cst_10 [1, 2] : vector<1x8x128xf32> to vector<1xf32>
      %21 = vector.shape_cast %20 : vector<1xf32> to vector<1x1x1xf32>
      %22 = vector.extract %21[0, 0, 0] : f32 from vector<1x1x1xf32>
      %c0_11 = arith.constant 0 : index
      %c0_12 = arith.constant 0 : index
      %23 = vector.load %arg4[%c0_11, %c0_12] : memref<8x32xf32, #tpu.memory_space<vmem>>, vector<8x32xf32>
      %cst_13 = arith.constant dense<0.000000e+00> : vector<32xf32>
      %24 = vector.multi_reduction <add>, %23, %cst_13 [0] : vector<8x32xf32> to vector<32xf32>
      %25 = vector.shape_cast %24 : vector<32xf32> to vector<1x32xf32>
      %cst_14 = arith.constant 8.000000e+00 : f32
      %26 = vector.broadcast %cst_14 : f32 to vector<1x32xf32>
      %27 = arith.divf %25, %26 : vector<1x32xf32>
      %28 = vector.broadcast %27 : vector<1x32xf32> to vector<8x32xf32>
      %29 = arith.subf %23, %28 : vector<8x32xf32>
      %30 = arith.mulf %29, %29 : vector<8x32xf32>
      %cst_15 = arith.constant dense<0.000000e+00> : vector<32xf32>
      %31 = vector.multi_reduction <add>, %30, %cst_15 [0] : vector<8x32xf32> to vector<32xf32>
      %cst_16 = arith.constant 8.000000e+00 : f32
      %32 = vector.broadcast %cst_16 : f32 to vector<32xf32>
      %33 = arith.divf %31, %32 : vector<32xf32>
      %34 = vector.shape_cast %33 : vector<32xf32> to vector<1x32xf32>
      %cst_17 = arith.constant dense<0.000000e+00> : vector<1xf32>
      %35 = vector.multi_reduction <add>, %34, %cst_17 [1] : vector<1x32xf32> to vector<1xf32>
      %36 = vector.shape_cast %35 : vector<1xf32> to vector<1x1xf32>
      %37 = vector.extract %36[0, 0] : f32 from vector<1x1xf32>
      %cst_18 = arith.constant 1.000000e-01 : f32
      %38 = arith.divf %cst_18, %37 : f32
      %39 = arith.addf %17, %38 : f32
      %cst_19 = arith.constant 1.000000e-07 : f32
      %40 = arith.mulf %cst_19, %22 : f32
      %41 = arith.addf %39, %40 : f32
      %c0_20 = arith.constant 0 : index
      %c0_21 = arith.constant 0 : index
      %42 = memref.load %arg5[%c0_20, %c0_21] : memref<1x1xf32, #tpu.memory_space<smem>>
      memref.store %41, %arg5[%c0_20, %c0_21] : memref<1x1xf32, #tpu.memory_space<smem>>
    } else {
    }
    return
  }
  func.func @transform_0(%arg0: i32) -> (i32, i32) {
    %c0_i32 = arith.constant 0 : i32
    %0 = arith.minsi %arg0, %c0_i32 : i32
    %c0_i32_0 = arith.constant 0 : i32
    %c0_i32_1 = arith.constant 0 : i32
    return %0, %c0_i32_0 : i32, i32
  }
  func.func @transform_1(%arg0: i32) -> (i32, i32) {
    %c0_i32 = arith.constant 0 : i32
    %0 = arith.minsi %arg0, %c0_i32 : i32
    %c0_i32_0 = arith.constant 0 : i32
    %c0_i32_1 = arith.constant 0 : i32
    return %0, %c0_i32_0 : i32, i32
  }
  func.func @transform_2(%arg0: i32) -> (i32, i32) {
    %c0_i32 = arith.constant 0 : i32
    %0 = arith.minsi %arg0, %c0_i32 : i32
    %c0_i32_0 = arith.constant 0 : i32
    %c0_i32_1 = arith.constant 0 : i32
    return %0, %c0_i32_0 : i32, i32
  }
  func.func @transform_3(%arg0: i32) -> (i32, i32) {
    %c0_i32 = arith.constant 0 : i32
    %c0_i32_0 = arith.constant 0 : i32
    %c0_i32_1 = arith.constant 0 : i32
    return %c0_i32, %c0_i32_0 : i32, i32
  }
  func.func @transform_4(%arg0: i32) -> (i32, i32) {
    %c0_i32 = arith.constant 0 : i32
    %c0_i32_0 = arith.constant 0 : i32
    %c0_i32_1 = arith.constant 0 : i32
    return %c0_i32, %c0_i32_0 : i32, i32
  }
}

</mosaic_0001>

<bundles_post_ra>
// kernel: tpu_custom_call.1
= control target key start
LH: loop header
LB: loop body
LE: loop exit
PB: predicated region body
PF: predicated region fallthrough
CT: control target
= control target key end

     0   :  { %9 = vsyncpa [#allocation5], 0  ;;  %s338_s0 = inlined_call_operand.hbm [shape: f32[16,128], index: 0, kind: input, shape index: {}]   ;;  %s339_s1 = inlined_call_operand.hbm [shape: f32[16,128], index: 1, kind: input, shape index: {}]   ;;  %s340_s2 = inlined_call_operand.hbm [shape: f32[16,128], index: 2, kind: input, shape index: {}]   ;;  %s341_s3 = inlined_call_operand.hbm [shape: f32[8,32], index: 3, kind: input, shape index: {}]   ;;  %s342_s4 = inlined_call_operand.hbm [shape: f32[1,1], index: 4, kind: output, shape index: {}]  }
   0x1   :  { %10 = vsyncpa [#allocation8], 0 }
   0x2   :  { %11 = vsyncpa [#allocation11], 0 }
   0x3   :  { %12 = vsyncpa [#allocation6], 0  ;;  %s288_s15 = smov [#allocation7]   ;;  %s289_s17 = smov [#allocation4]  }
   0x4   :  { %s30_s16 = sshll.u32 %s288_s15, 4  ;;  %s18_s18 = sshll.u32 %s289_s17, 4  ;;  %s31_s16 = int_to_ptr.vmem [resolvable:$true] %s30_s16  ;;  %s19_s18 = int_to_ptr.vmem [resolvable:$true] %s18_s18 }
   0x5   :  { %s200_s19 = scalar_lea.vmem %s31_s16, 256  ;;  %p205_p1 = scmp.lt.s32.totalorder %s31_s16, %s31_s16 }
   0x6   :  { %p201_p0 = scmp.ne.s32.totalorder %s31_s16, %s200_s19  ;;  %p206_p2 = scmp.lt.s32.totalorder %s200_s19, %s200_s19 }
   0x8   :  { %p207_p3 = por %p206_p2, %p205_p1 }
   0xa   :  { %p208_p4 = pnand %p207_p3, %p201_p0 }
   0xc   :  { %211 = shalt.err (!%p208_p4)
}
   0xd   :  { %s290_s20 = smov 128   ;;  %s291_s21 = smov 8  }
   0xe   :  { %36 = dma.hbm_to_vmem [thread:$0]  %s339_s1, 256, %s31_s16, [#allocation8], %s290_s20, %s290_s20, %s291_s21  }
   0xf   :  { %s220_s24 = scalar_lea.vmem %s19_s18, 256  ;;  %p225_p6 = scmp.lt.s32.totalorder %s19_s18, %s19_s18 }
  0x10   :  { %p221_p5 = scmp.ne.s32.totalorder %s19_s18, %s220_s24  ;;  %p226_p7 = scmp.lt.s32.totalorder %s220_s24, %s220_s24 }
  0x12   :  { %p227_p8 = por %p226_p7, %p225_p6 }
  0x14   :  { %p228_p9 = pnand %p227_p8, %p221_p5 }
  0x16   :  { %231 = shalt.err (!%p228_p9)
}
  0x17   :  { %24 = dma.hbm_to_vmem [thread:$0]  %s338_s0, 256, %s19_s18, [#allocation5], %s290_s20, %s290_s20, %s291_s21  }
  0x18   :  { %s292_s27 = smov [#allocation9]   ;;  %s293_s29 = smov [#allocation10]  }
  0x19   :  { %s42_s28 = sshll.u32 %s292_s27, 4  ;;  %s55_s30 = sshll.u32 %s293_s29, 4  ;;  %s43_s28 = int_to_ptr.vmem [resolvable:$true] %s42_s28  ;;  %s56_s30 = int_to_ptr.vmem [resolvable:$true] %s55_s30 }
  0x1a   :  { %s240_s5 = scalar_lea.vmem %s43_s28, 256  ;;  %p245_p11 = scmp.lt.s32.totalorder %s43_s28, %s43_s28 }
  0x1b   :  { %p241_p10 = scmp.ne.s32.totalorder %s43_s28, %s240_s5  ;;  %p246_p12 = scmp.lt.s32.totalorder %s240_s5, %s240_s5 }
  0x1d   :  { %p247_p13 = por %p246_p12, %p245_p11 }
  0x1f   :  { %p248_p0 = pnand %p247_p13, %p241_p10 }
  0x21   :  { %251 = shalt.err (!%p248_p0)
}
  0x22   :  { %48 = dma.hbm_to_vmem [thread:$0]  %s340_s2, 256, %s43_s28, [#allocation8], %s290_s20, %s290_s20, %s291_s21  }
  0x23   :  { %s260_s7 = scalar_lea.vmem %s56_s30, 128  ;;  %p265_p2 = scmp.lt.s32.totalorder %s56_s30, %s56_s30 }
  0x24   :  { %p261_p1 = scmp.ne.s32.totalorder %s56_s30, %s260_s7  ;;  %p266_p3 = scmp.lt.s32.totalorder %s260_s7, %s260_s7 }
  0x26   :  { %p267_p4 = por %p266_p3, %p265_p2 }
  0x28   :  { %p268_p5 = pnand %p267_p4, %p261_p1 }
  0x2a   :  { %271 = shalt.err (!%p268_p5)
}
  0x2b   :  { %58 = dma.hbm_to_vmem [thread:$0]  %s341_s3, 128, %s56_s30, [#allocation11]  }
  0x2c   :  { %280 = dma.done.wait [#allocation5], 256  }
  0x2d   :  { %281 = vsyncadd [#allocation5], 4294967040 }
  0x2e   :  { %282 = dma.done.wait [#allocation8], 512  }
  0x2f   :  { %283 = vsyncadd [#allocation8], 4294966784 }
  0x30   :  { %284 = dma.done.wait [#allocation11], 128  }
  0x31   :  { %285 = vsyncadd [#allocation11], 4294967168  ;;  %v81_v0 = vld [vmem:[#allocation4] sm:$0xff]  ;;  %v82_v1 = vld [vmem:[#allocation4 + $0x8] sm:$0xff]  ;;  %vm126_vm0 = vcmask 261120   ;;  %s294_s16 = smov [#allocation12]  }
  0x32   :  { %v83_v2 = vld [vmem:[#allocation7] sm:$0xff]  ;;  %v84_v3 = vld [vmem:[#allocation7 + $0x8] sm:$0xff]  ;;  %v93_v5 = vld [vmem:[#allocation9] sm:$0xff] }
  0x33   :  { %v85_v4 = vsub.f32 %v81_v0, %v83_v2  ;;  %v94_v6 = vld [vmem:[#allocation9 + $0x8] sm:$0xff]  ;;  %v86_v7 = vsub.f32 %v82_v1, %v84_v3  ;;  %v125_v8 = vld [vmem:[#allocation10] sm:$0xff]  ;;  %v95_v12 = vand.u32 2147483647, %v93_v5 }
  0x34   :  { %v127_v10 = vsel %vm126_vm0, %v125_v8, 0.0  ;;  %v96_v13 = vand.u32 2147483647, %v94_v6 }
  0x35   :  { %v87_v9 = vmul.f32 %v85_v4, %v85_v4  ;;  %v88_v11 = vmul.f32 %v86_v7, %v86_v7  ;;  %v128_v14 = vrot.slane %v127_v10, 4 }
  0x36   :  { %v98_v17 = vadd.f32 %v96_v13, %v95_v12 }
  0x37   :  { %v90_v15 = vadd.f32 %v88_v11, %v87_v9  ;;  %v129_v16 = vadd.f32 %v128_v14, %v127_v10 }
  0x39   :  { %105 = vadd.xlane.f32.xlu0 %v90_v15  ;;  %v130_v18 = vrot.slane %v129_v16, 2 }
  0x3b   :  { %v131_v19 = vadd.f32 %v130_v18, %v129_v16 }
  0x3d   :  { %116 = vadd.xlane.f32.xlu0 %v98_v17  ;;  %v132_v20 = vrot.slane %v131_v19, 1 }
  0x3f   :  { %v133_v21 = vadd.f32 %v132_v20, %v131_v19 }
  0x41   :  { %v135_v22 = vmul.f32 0.125, %v133_v21 }
  0x43   :  { %v136_v23 = vsub.f32 %v125_v8, %v135_v22 }
  0x45   :  { %v137_v24 = vmul.f32 %v136_v23, %v136_v23 }
  0x47   :  { %v138_v25 = vsel %vm126_vm0, %v137_v24, 0.0 }
  0x48   :  { %v139_v26 = vrot.slane %v138_v25, 4 }
  0x4a   :  { %v140_v27 = vadd.f32 %v139_v26, %v138_v25 }
  0x4c   :  { %v141_v28 = vrot.slane %v140_v27, 2 }
  0x4e   :  { %v142_v29 = vadd.f32 %v141_v28, %v140_v27 }
  0x50   :  { %v143_v30 = vrot.slane %v142_v29, 1 }
  0x52   :  { %v144_v31 = vadd.f32 %v143_v30, %v142_v29 }
  0x54   :  { %v145_v32 = vmul.f32 0.125, %v144_v31 }
  0x56   :  { %v146_v33 = vsel %vm126_vm0, %v145_v32, 0.0 }
  0x57   :  { %147 = vadd.xlane.f32.xlu1 %v146_v33 }
  0xc2   :  { %v106_v34 = vpop.xlane.xlu0 %105 }
  0xc3   :  { %v107_v35 = vrot.slane %v106_v34, 4 }
  0xc5   :  { %v108_v36 = vadd.f32 %v107_v35, %v106_v34 }
  0xc6   :  { %v117_v37 = vpop.xlane.xlu0 %116 }
  0xc7   :  { %v109_v38 = vrot.slane %v108_v36, 2  ;;  %v118_v39 = vrot.slane %v117_v37, 4 }
  0xc9   :  { %v119_v40 = vadd.f32 %v118_v39, %v117_v37  ;;  %v110_v41 = vadd.f32 %v109_v38, %v108_v36 }
  0xcb   :  { %v120_v42 = vrot.slane %v119_v40, 2  ;;  %v111_v43 = vrot.slane %v110_v41, 1 }
  0xcd   :  { %v121_v44 = vadd.f32 %v120_v42, %v119_v40  ;;  %v112_v45 = vadd.f32 %v111_v43, %v110_v41 }
  0xcf   :  { %175 = vpush %v112_v45  ;;  %v122_v46 = vrot.slane %v121_v44, 1 }
  0xd1   :  { %v123_v47 = vadd.f32 %v122_v46, %v121_v44 }
  0xd3   :  { %177 = vpush %v123_v47 }
  0xe0   :  { %v148_v48 = vpop.xlane.xlu1 %147 }
  0xe1   :  { %179 = vpush %v148_v48 }
 0x100   :  { %s176_s2 = spop %175 }
 0x101   :  { %s114_s10 = smul.f32 0.00048828125, %s176_s2 }
 0x104   :  { %s178_s3 = spop %177 }
 0x105   :  { %s155_s13 = smul.f32 1e-07, %s178_s3 }
 0x112   :  { %s180_s9 = spop %179 }
 0x113   :  { %v150_v49 = vstv %s180_s9 }
 0x114   :  { %190 = vrcp.f32 %v150_v49 }
 0x121   :  { %v191_v50 = vpop.eup %190 }
 0x122   :  { %181 = vpush %v191_v50 }
 0x153   :  { %s182_s11 = spop %181 }
 0x154   :  { %s153_s12 = smul.f32 0.1, %s182_s11 }
 0x156   :  { %s154_s14 = sadd.f32 %s153_s12, %s114_s10 }
 0x158   :  { %s156_s15 = sadd.f32 %s155_s13, %s154_s14 }
 0x15a   :  { %158 = sst [smem:[#allocation12]] %s156_s15 }
 0x15b   :  { %166 = dma.smem_to_hbm %s294_s16, 16, %s342_s4, [#allocation6]  }
 0x15c   :  { %286 = dma.done.wait [#allocation6], 16  }
 0x15d   :  { %287 = vsyncadd [#allocation6], 4294967280 }
 0x15e   :  { %170 = sfence }
 0x15f   :  { %171 = vsyncpa [#allocation5], 1 }
 0x160   :  { %172 = vsyncpa [#allocation8], 1 }
 0x161   :  { %173 = vsyncpa [#allocation11], 1 }
 0x162   :  { %174 = vsyncpa [#allocation6], 1 }

</bundles_post_ra>
